<compile_context>
chip_gen: v5e
topology: v5e:2x2
jax: 0.10.0
libtpu: 0.0.40
codegen_flags: <defaults>
</compile_context>

<pallas_src>
import jax
import jax.numpy as jnp
from jax.experimental import pallas as pl
from jax.experimental.pallas import tpu as pltpu

LANES = 128                 # vreg lane width
MAX_TILE_ROWS = 1024        # (1024,128) f32 = 512 KiB per input tile
NUM_SPLITS = 2              # leading 'parallel' grid axis (v7x megacore)
_FUSED_MAX_ELEMS = 128 * 1024   # single fused kernel below this size


def _cdiv(a, b):
    return -(-a // b)


def _round_up(a, b):
    return _cdiv(a, b) * b


def _to_slab(x, rows):
    """Flatten to f32 and reshape/pad into a (rows, 128) lane-dense slab."""
    flat = x.reshape(-1).astype(jnp.float32)
    total = rows * LANES
    n = flat.shape[0]
    if total != n:
        flat = jnp.pad(flat, (0, total - n))   # zeros are loss-neutral
    return flat.reshape(rows, LANES)


# --------------------------------------------------------------------------
# Fused single-call kernel for small inputs (one HBM read of each tensor).
# --------------------------------------------------------------------------
def _make_fused_kernel(threshold):
    def kernel(p_ref, t_ref, out_ref):
        t = t_ref[...]
        p = jnp.where(t > 0.0, p_ref[...], 0.0)
        diff = jnp.abs(t - p)
        delta = jnp.float32(threshold) * jnp.max(diff)
        inv_two_delta = 1.0 / (2.0 * delta)          # one scalar divide
        part1 = jnp.where(diff < delta, diff, 0.0)
        part2 = jnp.where(diff > delta, diff * diff, 0.0) * inv_two_delta
        out_ref[0, 0] = jnp.sum(part1 + part2)
    return kernel


# --------------------------------------------------------------------------
# Two-pass tiled kernels for large inputs.
# --------------------------------------------------------------------------
def _max_diff_kernel(p_ref, t_ref, max_ref, acc_ref):
    """Per-core running elementwise max in VMEM; one reduce at the last tile."""
    i = pl.program_id(1)

    @pl.when(i == 0)
    def _():
        acc_ref[...] = jnp.zeros_like(acc_ref)       # diff >= 0 -> 0 is identity

    t = t_ref[...]
    p = jnp.where(t > 0.0, p_ref[...], 0.0)
    diff = jnp.abs(t - p)
    acc_ref[...] = jnp.maximum(acc_ref[...], diff)   # pure VALU, no reduce

    @pl.when(i == pl.num_programs(1) - 1)
    def _():
        max_ref[0, 0] = jnp.max(acc_ref[...])        # single cross-lane reduce


def _berhu_sum_kernel(s_ref, p_ref, t_ref, out_ref, acc_ref):
    """Per-core running elementwise sum; delta / 1/(2*delta) come from SMEM."""
    i = pl.program_id(1)

    @pl.when(i == 0)
    def _():
        acc_ref[...] = jnp.zeros_like(acc_ref)

    delta = s_ref[0, 0]
    inv_two_delta = s_ref[0, 1]

    t = t_ref[...]
    p = jnp.where(t > 0.0, p_ref[...], 0.0)
    diff = jnp.abs(t - p)
    # NOTE: keep two separate selects; at diff == delta both are 0 (PyTorch quirk).
    part1 = jnp.where(diff < delta, diff, 0.0)
    part2 = jnp.where(diff > delta, diff * diff, 0.0) * inv_two_delta
    acc_ref[...] = acc_ref[...] + part1 + part2      # pure VALU, no reduce

    @pl.when(i == pl.num_programs(1) - 1)
    def _():
        out_ref[0, 0] = jnp.sum(acc_ref[...])        # single cross-lane reduce


def berhu_loss(pred, target, threshold=0.2):
    assert pred.ndim == target.ndim, "inconsistent dimensions"

    n = 1
    for d in pred.shape:
        n *= d

    # ---------------- small-input fused path ----------------
    if n <= _FUSED_MAX_ELEMS:
        rows = _round_up(_cdiv(n, LANES), 8)
        p2 = _to_slab(pred, rows)
        t2 = _to_slab(target, rows)
        loss = pl.pallas_call(
            _make_fused_kernel(threshold),
            out_shape=jax.ShapeDtypeStruct((1, 1), jnp.float32),
            grid=(1,),
            in_specs=[pl.BlockSpec((rows, LANES), lambda i: (0, 0)),
                      pl.BlockSpec((rows, LANES), lambda i: (0, 0))],
            out_specs=pl.BlockSpec((1, 1), lambda i: (0, 0),
                                   memory_space=pltpu.MemorySpace.SMEM),
            compiler_params=pltpu.CompilerParams(
                dimension_semantics=("arbitrary",)),
        )(p2, t2)
        return loss[0, 0]

    # ---------------- large-input two-pass path ----------------
    rows_needed = _cdiv(n, LANES)
    tile_rows = min(MAX_TILE_ROWS, _round_up(_cdiv(rows_needed, NUM_SPLITS), 8))
    rows_padded = _round_up(rows_needed, tile_rows * NUM_SPLITS)
    num_tiles = rows_padded // tile_rows
    tiles_per_split = num_tiles // NUM_SPLITS

    p2 = _to_slab(pred, rows_padded)
    t2 = _to_slab(target, rows_padded)

    tile_spec = pl.BlockSpec(
        (tile_rows, LANES), lambda c, i: (c * tiles_per_split + i, 0))
    partial_out_spec = pl.BlockSpec(
        (1, 1), lambda c, i: (c, 0), memory_space=pltpu.MemorySpace.SMEM)
    scalars_spec = pl.BlockSpec(
        (1, 2), lambda c, i: (0, 0), memory_space=pltpu.MemorySpace.SMEM)
    cparams = pltpu.CompilerParams(
        dimension_semantics=("parallel", "arbitrary"))

    # Pass 1: per-core partial maxima of diff.
    partial_max = pl.pallas_call(
        _max_diff_kernel,
        out_shape=jax.ShapeDtypeStruct((NUM_SPLITS, 1), jnp.float32),
        grid=(NUM_SPLITS, tiles_per_split),
        in_specs=[tile_spec, tile_spec],
        out_specs=partial_out_spec,
        scratch_shapes=[pltpu.VMEM((tile_rows, LANES), jnp.float32)],
        compiler_params=cparams,
    )(p2, t2)

    # Tiny scalar glue in plain JAX: combine partials, hoist the division.
    max_diff = jnp.max(partial_max)
    delta = jnp.float32(threshold) * max_diff
    scalars = jnp.stack([delta, 1.0 / (2.0 * delta)]).reshape(1, 2)
    scalars = scalars.astype(jnp.float32)

    # Pass 2: per-core partial sums of the BerHu loss.
    partial_sum = pl.pallas_call(
        _berhu_sum_kernel,
        out_shape=jax.ShapeDtypeStruct((NUM_SPLITS, 1), jnp.float32),
        grid=(NUM_SPLITS, tiles_per_split),
        in_specs=[scalars_spec, tile_spec, tile_spec],
        out_specs=partial_out_spec,
        scratch_shapes=[pltpu.VMEM((tile_rows, LANES), jnp.float32)],
        compiler_params=cparams,
    )(scalars, p2, t2)

    return jnp.sum(partial_sum)


def _berhu_ref(pred, target, threshold=0.2):
    """Pure-JAX reference reproducing the PyTorch semantics."""
    t = target.astype(jnp.float32)
    p = pred.astype(jnp.float32) * (t > 0.0).astype(jnp.float32)
    diff = jnp.abs(t - p)
    delta = threshold * jnp.max(diff)
    part1 = jnp.where(diff < delta, diff, 0.0)
    part2 = jnp.where(diff * diff - delta * delta > 0.0, diff * diff, 0.0) / (2.0 * delta)
    return jnp.sum(part1 + part2)


if __name__ == "__main__":
    key = jax.random.PRNGKey(0)

    # Test 1: small NCHW input -> fused single-kernel path.
    kp, kt, key = jax.random.split(key, 3)
    pred = jax.random.normal(kp, (2, 4, 16, 16), dtype=jnp.float32)
    target = jax.random.normal(kt, (2, 4, 16, 16), dtype=jnp.float32)
    out = jax.block_until_ready(berhu_loss(pred, target, threshold=0.2))
    ref = jax.block_until_ready(_berhu_ref(pred, target, threshold=0.2))
    assert jnp.allclose(out, ref, rtol=1e-4, atol=1e-4), (out, ref)

    # Test 2: larger input -> tiled two-pass path (big tiles + core split).
    kp2, kt2 = jax.random.split(key)
    pred2 = jax.random.normal(kp2, (2, 4, 256, 256), dtype=jnp.float32)
    target2 = jax.random.normal(kt2, (2, 4, 256, 256), dtype=jnp.float32)
    out2 = jax.block_until_ready(berhu_loss(pred2, target2, threshold=0.2))
    ref2 = jax.block_until_ready(_berhu_ref(pred2, target2, threshold=0.2))
    assert jnp.allclose(out2, ref2, rtol=1e-4, atol=1e-4), (out2, ref2)

    print("KERNEL_OK")
</pallas_src>

<mosaic_0001>
module attributes {stable_mosaic.version = 11 : i64} {
  func.func @kernel(%arg0: i32, %arg1: memref<16x128xf32, #tpu.memory_space<vmem>>, %arg2: memref<16x128xf32, #tpu.memory_space<vmem>>, %arg3: memref<1x1xf32, #tpu.memory_space<smem>>) attributes {dimension_semantics = [#tpu.dimension_semantics<arbitrary>], iteration_bounds = array<i64: 1>, scalar_prefetch = 0 : i64, scratch_operands = 0 : i64, tpu.core_type = #tpu.core_type<tc>, window_params = [{pipeline_mode = #tpu.pipeline_mode<synchronous>, transform_indices = @transform_0, window_bounds = array<i64: 16, 128>}, {pipeline_mode = #tpu.pipeline_mode<synchronous>, transform_indices = @transform_1, window_bounds = array<i64: 16, 128>}, {transform_indices = @transform_2, window_bounds = array<i64: 1, 1>}]} {
    %c0 = arith.constant 0 : index
    %c0_0 = arith.constant 0 : index
    %0 = vector.load %arg2[%c0, %c0_0] : memref<16x128xf32, #tpu.memory_space<vmem>>, vector<16x128xf32>
    %cst = arith.constant 0.000000e+00 : f32
    %1 = vector.broadcast %cst : f32 to vector<16x128xf32>
    %2 = arith.cmpf ogt, %0, %1 : vector<16x128xf32>
    %c0_1 = arith.constant 0 : index
    %c0_2 = arith.constant 0 : index
    %3 = vector.load %arg1[%c0_1, %c0_2] : memref<16x128xf32, #tpu.memory_space<vmem>>, vector<16x128xf32>
    %cst_3 = arith.constant 0.000000e+00 : f32
    %4 = vector.broadcast %cst_3 : f32 to vector<16x128xf32>
    %5 = arith.select %2, %3, %4 : vector<16x128xi1>, vector<16x128xf32>
    %6 = arith.subf %0, %5 : vector<16x128xf32>
    %7 = math.absf %6 : vector<16x128xf32>
    %8 = vector.shape_cast %7 : vector<16x128xf32> to vector<1x16x128xf32>
    %cst_4 = arith.constant dense<0xFF800000> : vector<1xf32>
    %9 = vector.multi_reduction <maximumf>, %8, %cst_4 [1, 2] : vector<1x16x128xf32> to vector<1xf32>
    %10 = vector.shape_cast %9 : vector<1xf32> to vector<1x1x1xf32>
    %11 = vector.extract %10[0, 0, 0] : f32 from vector<1x1x1xf32>
    %cst_5 = arith.constant 2.000000e-01 : f32
    %12 = arith.mulf %cst_5, %11 : f32
    %cst_6 = arith.constant 2.000000e+00 : f32
    %13 = arith.mulf %cst_6, %12 : f32
    %cst_7 = arith.constant 1.000000e+00 : f32
    %14 = arith.divf %cst_7, %13 : f32
    %15 = vector.broadcast %12 : f32 to vector<16x128xf32>
    %16 = arith.cmpf olt, %7, %15 : vector<16x128xf32>
    %cst_8 = arith.constant 0.000000e+00 : f32
    %17 = vector.broadcast %cst_8 : f32 to vector<16x128xf32>
    %18 = arith.select %16, %7, %17 : vector<16x128xi1>, vector<16x128xf32>
    %19 = vector.broadcast %12 : f32 to vector<16x128xf32>
    %20 = arith.cmpf ogt, %7, %19 : vector<16x128xf32>
    %21 = arith.mulf %7, %7 : vector<16x128xf32>
    %cst_9 = arith.constant 0.000000e+00 : f32
    %22 = vector.broadcast %cst_9 : f32 to vector<16x128xf32>
    %23 = arith.select %20, %21, %22 : vector<16x128xi1>, vector<16x128xf32>
    %24 = vector.broadcast %14 : f32 to vector<16x128xf32>
    %25 = arith.mulf %23, %24 : vector<16x128xf32>
    %26 = arith.addf %18, %25 : vector<16x128xf32>
    %27 = vector.shape_cast %26 : vector<16x128xf32> to vector<1x16x128xf32>
    %cst_10 = arith.constant dense<0.000000e+00> : vector<1xf32>
    %28 = vector.multi_reduction <add>, %27, %cst_10 [1, 2] : vector<1x16x128xf32> to vector<1xf32>
    %29 = vector.shape_cast %28 : vector<1xf32> to vector<1x1x1xf32>
    %30 = vector.extract %29[0, 0, 0] : f32 from vector<1x1x1xf32>
    %c0_11 = arith.constant 0 : index
    %c0_12 = arith.constant 0 : index
    %31 = memref.load %arg3[%c0_11, %c0_12] : memref<1x1xf32, #tpu.memory_space<smem>>
    memref.store %30, %arg3[%c0_11, %c0_12] : memref<1x1xf32, #tpu.memory_space<smem>>
    return
  }
  func.func @transform_0(%arg0: i32) -> (i32, i32) {
    %c0_i32 = arith.constant 0 : i32
    %c0_i32_0 = arith.constant 0 : i32
    %c0_i32_1 = arith.constant 0 : i32
    return %c0_i32, %c0_i32_0 : i32, i32
  }
  func.func @transform_1(%arg0: i32) -> (i32, i32) {
    %c0_i32 = arith.constant 0 : i32
    %c0_i32_0 = arith.constant 0 : i32
    %c0_i32_1 = arith.constant 0 : i32
    return %c0_i32, %c0_i32_0 : i32, i32
  }
  func.func @transform_2(%arg0: i32) -> (i32, i32) {
    %c0_i32 = arith.constant 0 : i32
    %c0_i32_0 = arith.constant 0 : i32
    %c0_i32_1 = arith.constant 0 : i32
    return %c0_i32, %c0_i32_0 : i32, i32
  }
}

</mosaic_0001>

<bundles_post_ra>
// kernel: tpu_custom_call.1
= control target key start
LH: loop header
LB: loop body
LE: loop exit
PB: predicated region body
PF: predicated region fallthrough
CT: control target
= control target key end

     0   :  { %7 = vsyncpa [#allocation3], 0  ;;  %s237_s0 = inlined_call_operand.hbm [shape: f32[16,128], index: 0, kind: input, shape index: {}]   ;;  %s238_s1 = inlined_call_operand.hbm [shape: f32[16,128], index: 1, kind: input, shape index: {}]   ;;  %s239_s2 = inlined_call_operand.hbm [shape: f32[1,1], index: 2, kind: output, shape index: {}]  }
   0x1   :  { %8 = vsyncpa [#allocation6], 0 }
   0x2   :  { %9 = vsyncpa [#allocation4], 0  ;;  %s14_s11 = sshll.u32 %s237_s0, 4  ;;  %s208_s12 = smov [#allocation2]   ;;  %s15_s11 = int_to_ptr.hbm [resolvable:$true] %s14_s11 }
   0x3   :  { %s16_s13 = sshll.u32 %s208_s12, 4  ;;  %s27_s16 = sshll.u32 %s238_s1, 4  ;;  %s17_s13 = int_to_ptr.vmem [resolvable:$true] %s16_s13  ;;  %s28_s16 = int_to_ptr.hbm [resolvable:$true] %s27_s16 }
   0x4   :  { %s209_s17 = smov 128   ;;  %s210_s18 = smov 8  }
   0x5   :  { %22 = dma.hbm_to_vmem [thread:$0]  %s15_s11, 256, %s17_s13, [#allocation3], %s209_s17, %s209_s17, %s210_s18  }
   0x6   :  { %s211_s19 = smov [#allocation5]  }
   0x7   :  { %s29_s20 = sshll.u32 %s211_s19, 4  ;;  %s30_s20 = int_to_ptr.vmem [resolvable:$true] %s29_s20 }
   0x8   :  { %35 = dma.hbm_to_vmem [thread:$0]  %s28_s16, 256, %s30_s20, [#allocation6], %s209_s17, %s209_s17, %s210_s18  }
   0x9   :  { %202 = dma.done.wait [#allocation3], 256  }
   0xa   :  { %203 = vsyncadd [#allocation3], 4294967040 }
   0xb   :  { %204 = dma.done.wait [#allocation6], 256  }
   0xc   :  { %205 = vsyncadd [#allocation6], 4294967040  ;;  %v44_v0 = vld [vmem:[#allocation5] sm:$0xff]  ;;  %v45_v1 = vld [vmem:[#allocation5 + $0x8] sm:$0xff]  ;;  %s117_s25 = sshll.u32 %s239_s2, 4  ;;  %s212_s27 = smov [#allocation7]   ;;  %s118_s25 = int_to_ptr.hbm [resolvable:$true] %s117_s25 }
   0xd   :  { %v48_v2 = vld [vmem:[#allocation2] sm:$0xff]  ;;  %vm46_vm0 = vcmp.gt.f32.partialorder %v44_v0, 0.0  ;;  %vm47_vm1 = vcmp.gt.f32.partialorder %v45_v1, 0.0  ;;  %v49_v3 = vld [vmem:[#allocation2 + $0x8] sm:$0xff] }
   0xe   :  { %v50_v4 = vsel %vm46_vm0, %v48_v2, 0.0  ;;  %v51_v5 = vsel %vm47_vm1, %v49_v3, 0.0 }
   0xf   :  { %v52_v6 = vsub.f32 %v44_v0, %v50_v4  ;;  %v53_v7 = vsub.f32 %v45_v1, %v51_v5 }
  0x11   :  { %v54_v8 = vand.u32 2147483647, %v52_v6  ;;  %v55_v9 = vand.u32 2147483647, %v53_v7 }
  0x13   :  { %v56_v10 = vmax.f32 %v54_v8, %v55_v9  ;;  %v91_v30 = vmul.f32 %v54_v8, %v54_v8  ;;  %v92_v31 = vmul.f32 %v55_v9, %v55_v9 }
  0x15   :  { %57 = vmax.xlane.f32.xlu0 %v56_v10 }
  0x88   :  { %v58_v11 = vpop.xlane.xlu0 %57 }
  0x89   :  { %v59_v12 = vrot.slane %v58_v11, 4 }
  0x8b   :  { %v60_v13 = vmax.f32 %v58_v11, %v59_v12 }
  0x8d   :  { %v61_v14 = vrot.slane %v60_v13, 2 }
  0x8f   :  { %v62_v15 = vmax.f32 %v60_v13, %v61_v14 }
  0x91   :  { %v63_v16 = vrot.slane %v62_v15, 1 }
  0x93   :  { %v64_v17 = vmax.f32 %v62_v15, %v63_v16 }
  0x95   :  { %129 = vpush %v64_v17 }
  0xc6   :  { %s130_s0 = spop %129 }
  0xc7   :  { %s66_s1 = smul.f32 0.2, %s130_s0 }
  0xc9   :  { %s67_s21 = smul.f32 2.0, %s66_s1  ;;  %v84_v29 = vstv %s66_s1 }
  0xca   :  { %vm89_vm6 = vcmp.gt.f32.partialorder %v54_v8, %v84_v29  ;;  %vm90_vm7 = vcmp.gt.f32.partialorder %v55_v9, %v84_v29  ;;  %vm85_vm8 = vcmp.lt.f32.partialorder %v54_v8, %v84_v29  ;;  %vm86_vm9 = vcmp.lt.f32.partialorder %v55_v9, %v84_v29 }
  0xcb   :  { %v68_v18 = vstv %s67_s21  ;;  %v93_v32 = vsel %vm89_vm6, %v91_v30, 0.0  ;;  %v94_v33 = vsel %vm90_vm7, %v92_v31, 0.0  ;;  %v87_v37 = vsel %vm85_vm8, %v54_v8, 0.0 }
  0xcc   :  { %140 = vrcp.f32 %v68_v18  ;;  %v80_v22 = vand.u32 2147483648, %v68_v18  ;;  %v78_v24 = vand.u32 2147483647, %v68_v18  ;;  %vm74_vm3 = vweird.f32 %v68_v18 }
  0xcd   :  { %v88_v38 = vsel %vm86_vm9, %v55_v9, 0.0 }
  0xce   :  { %v81_v26 = vor.u32 1.1754944e-38, %v80_v22  ;;  %vm79_vm5 = vcmp.eq.f32.partialorder %v78_v24, 8.507059e+37 }
  0xd2   :  { %v141_v19 = vpop.eup %140 }
  0xd3   :  { %v70_v20 = vmul.f32 %v141_v19, %v68_v18  ;;  %vm75_vm2 = vweird.f32 %v141_v19 }
  0xd4   :  { %vm76_vm4 = vmor %vm74_vm3, %vm75_vm2 }
  0xd5   :  { %v71_v21 = vsub.f32 1.0, %v70_v20 }
  0xd7   :  { %v72_v23 = vmul.f32 %v141_v19, %v71_v21 }
  0xd9   :  { %v73_v25 = vadd.f32 %v141_v19, %v72_v23 }
  0xdb   :  { %v77_v27 = vsel %vm76_vm4, %v141_v19, %v73_v25 }
  0xdc   :  { %v82_v28 = vsel %vm79_vm5, %v81_v26, %v77_v27 }
  0xdd   :  { %131 = vpush %v82_v28 }
 0x10e   :  { %s132_s22 = spop %131 }
 0x10f   :  { %v95_v34 = vstv %s132_s22 }
 0x110   :  { %v96_v35 = vmul.f32 %v95_v34, %v93_v32  ;;  %v97_v36 = vmul.f32 %v95_v34, %v94_v33 }
 0x112   :  { %v98_v39 = vadd.f32 %v96_v35, %v87_v37  ;;  %v99_v40 = vadd.f32 %v97_v36, %v88_v38 }
 0x114   :  { %v100_v41 = vadd.f32 %v99_v40, %v98_v39 }
 0x116   :  { %101 = vadd.xlane.f32.xlu0 %v100_v41 }
 0x189   :  { %v102_v42 = vpop.xlane.xlu0 %101 }
 0x18a   :  { %v103_v43 = vrot.slane %v102_v42, 4 }
 0x18c   :  { %v104_v44 = vadd.f32 %v103_v43, %v102_v42 }
 0x18e   :  { %v105_v45 = vrot.slane %v104_v44, 2 }
 0x190   :  { %v106_v46 = vadd.f32 %v105_v45, %v104_v44 }
 0x192   :  { %v107_v47 = vrot.slane %v106_v46, 1 }
 0x194   :  { %v108_v48 = vadd.f32 %v107_v47, %v106_v46 }
 0x196   :  { %133 = vpush %v108_v48 }
 0x1c7   :  { %s134_s26 = spop %133 }
 0x1c8   :  { %111 = sst [smem:[#allocation7]] %s134_s26 }
 0x1c9   :  { %120 = dma.smem_to_hbm %s212_s27, 16, %s118_s25, [#allocation4]  }
 0x1ca   :  { %206 = dma.done.wait [#allocation4], 16  }
 0x1cb   :  { %207 = vsyncadd [#allocation4], 4294967280 }
 0x1cc   :  { %125 = sfence }
 0x1cd   :  { %126 = vsyncpa [#allocation3], 1 }
 0x1ce   :  { %127 = vsyncpa [#allocation6], 1 }
 0x1cf   :  { %128 = vsyncpa [#allocation4], 1 }

</bundles_post_ra>
